<compile_context>
chip_gen: v6e
topology: v6e:2x2x1
jax: 0.10.0
libtpu: 0.0.40
codegen_flags: <defaults>
</compile_context>

<pallas_src>
import jax
import jax.numpy as jnp
from jax.experimental import pallas as pl
from jax.experimental.pallas import tpu as pltpu

LN_EPS = 1e-12  # BERT LayerNorm default eps


# ------------------------------- tiling helpers ------------------------------ #

def _round_up(x, m):
    return (x + m - 1) // m * m


def _choose_tm(m):
    """Row-tile: multiple of 8, capped at 512 rows (fits v7x 64 MiB VMEM with huge
    headroom), and small enough to give >=2 grid steps when there is enough work
    (pipelining + megacore)."""
    tm = min(512, _round_up(-(-m // 2), 8))
    return max(tm, 8)


def _pad_rows(x2d, m_pad):
    m = x2d.shape[0]
    if m_pad == m:
        return x2d
    return jnp.pad(x2d, ((0, m_pad - m), (0, 0)))


# ----------------------------- Pallas kernel bodies -------------------------- #

def _mlm_head_kernel(x_ref, w1_ref, b1_ref, g_ref, beta_ref, w2_ref, b2_ref, o_ref):
    # transform.dense
    h = jnp.dot(x_ref[...], w1_ref[...], preferred_element_type=jnp.float32) + b1_ref[...]
    # transform.transform_act_fn : GELU (tanh approximation; EUP tanh slot)
    h3 = h * h * h
    h = 0.5 * h * (1.0 + jnp.tanh(0.7978845608028654 * (h + 0.044715 * h3)))
    # transform.LayerNorm : single cross-lane reduce pair + rsqrt (EUP)
    mu = jnp.mean(h, axis=-1, keepdims=True)
    var = jnp.maximum(jnp.mean(h * h, axis=-1, keepdims=True) - mu * mu, 0.0)
    h = (h - mu) * jax.lax.rsqrt(var + LN_EPS)
    h = g_ref[...] * h + beta_ref[...]
    # decoder + bias (second matmul fused in the same tile, w2 VMEM-resident)
    o_ref[...] = (
        jnp.dot(h, w2_ref[...], preferred_element_type=jnp.float32) + b2_ref[...]
    )


def _img_decoder_kernel(x_ref, w_ref, b_ref, o_ref):
    # 1x1 conv == per-pixel matmul over channels
    o_ref[...] = (
        jnp.dot(x_ref[...], w_ref[...], preferred_element_type=jnp.float32) + b_ref[...]
    )


# ------------------------------ kernel wrappers ------------------------------ #

_COMPILER_PARAMS = pltpu.CompilerParams(
    dimension_semantics=("parallel",),          # row tiles are independent
    vmem_limit_bytes=32 * 1024 * 1024,          # headroom on v7x (64 MiB physical)
)


def mlm_prediction_head(x2d, w1, b1, gamma, beta, w2, b2):
    """BertLMPredictionHead on flattened tokens. x2d: (M, hidden) -> (M, vocab)."""
    m, k = x2d.shape
    hdim = w1.shape[1]
    v = w2.shape[1]
    tm = _choose_tm(m)
    m_pad = _round_up(m, tm)
    xp = _pad_rows(x2d, m_pad)

    cost = pl.CostEstimate(
        flops=2 * m_pad * k * hdim + 2 * m_pad * hdim * v,
        transcendentals=2 * m_pad * hdim,  # tanh + rsqrt
        bytes_accessed=4 * (m_pad * k + m_pad * v + k * hdim + hdim * v),
    )

    out = pl.pallas_call(
        _mlm_head_kernel,
        out_shape=jax.ShapeDtypeStruct((m_pad, v), jnp.float32),
        grid=(m_pad // tm,),
        in_specs=[
            pl.BlockSpec((tm, k), lambda i: (i, 0)),        # activations: tiled rows
            pl.BlockSpec((k, hdim), lambda i: (0, 0)),      # weights resident
            pl.BlockSpec((1, hdim), lambda i: (0, 0)),
            pl.BlockSpec((1, hdim), lambda i: (0, 0)),
            pl.BlockSpec((1, hdim), lambda i: (0, 0)),
            pl.BlockSpec((hdim, v), lambda i: (0, 0)),
            pl.BlockSpec((1, v), lambda i: (0, 0)),
        ],
        out_specs=pl.BlockSpec((tm, v), lambda i: (i, 0)),  # lane-dense (v % 128 == 0)
        compiler_params=_COMPILER_PARAMS,
        cost_estimate=cost,
    )(
        xp,
        w1,
        b1.reshape(1, hdim),
        gamma.reshape(1, hdim),
        beta.reshape(1, hdim),
        w2,
        b2.reshape(1, v),
    )
    return out[:m] if m_pad != m else out


def img_decoder_conv1x1(x2d, w, b):
    """1x1 Conv2d as matmul. x2d: (M, hidden) -> (M, patch**2 * 3)."""
    m, k = x2d.shape
    n = w.shape[1]
    tm = _choose_tm(m)
    m_pad = _round_up(m, tm)
    xp = _pad_rows(x2d, m_pad)

    cost = pl.CostEstimate(
        flops=2 * m_pad * k * n,
        transcendentals=0,
        bytes_accessed=4 * (m_pad * k + m_pad * n + k * n),
    )

    # NOTE: n = patch**2*3 is sub-128 for small patch sizes -> masked stores; output
    # is tiny here so we keep the exact layout instead of pad+slice (extra HBM pass).
    out = pl.pallas_call(
        _img_decoder_kernel,
        out_shape=jax.ShapeDtypeStruct((m_pad, n), jnp.float32),
        grid=(m_pad // tm,),
        in_specs=[
            pl.BlockSpec((tm, k), lambda i: (i, 0)),
            pl.BlockSpec((k, n), lambda i: (0, 0)),
            pl.BlockSpec((1, n), lambda i: (0, 0)),
        ],
        out_specs=pl.BlockSpec((tm, n), lambda i: (i, 0)),
        compiler_params=_COMPILER_PARAMS,
        cost_estimate=cost,
    )(xp, w, b.reshape(1, n))
    return out[:m] if m_pad != m else out


# -------------------------------- forward pass -------------------------------- #

def mbsd_pretrain_head_forward(text_seq_output, image_seq_output, params, patch_size):
    """Equivalent of MBSDPretrainHead.forward -> (mlm_logits, mpm_logits)."""
    mlm_logits = None
    mpm_logits = None

    if text_seq_output is not None:
        B, S, Hd = text_seq_output.shape
        flat = text_seq_output.reshape(B * S, Hd).astype(jnp.float32)
        logits = mlm_prediction_head(
            flat,
            params["mlm_dense_w"], params["mlm_dense_b"],
            params["mlm_ln_g"], params["mlm_ln_b"],
            params["mlm_decoder_w"], params["mlm_decoder_b"],
        )
        mlm_logits = logits.reshape(B, S, -1)

    if image_seq_output is not None:
        # NCHW -> NHWC -> (B*H*W, C): channels on the lane axis for the matmul.
        B, C, H, W = image_seq_output.shape
        r = patch_size
        x = jnp.transpose(image_seq_output, (0, 2, 3, 1)).reshape(B * H * W, C)
        y = img_decoder_conv1x1(x.astype(jnp.float32),
                                params["conv_w"], params["conv_b"])  # (B*H*W, 3*r*r)
        # PixelShuffle(r): out[b, c, h*r+i, w*r+j] = conv[b, c*r*r + i*r + j, h, w]
        y = y.reshape(B, H, W, 3, r, r)
        y = jnp.transpose(y, (0, 3, 1, 4, 2, 5))
        mpm_logits = y.reshape(B, 3, H * r, W * r)

    return mlm_logits, mpm_logits


# ------------------------------- parameter init -------------------------------- #

def init_params(key, hidden_size, vocab_size, patch_size):
    """Deterministic synthetic parameters (shapes follow the PyTorch module)."""
    ks = jax.random.split(key, 8)

    def w(k, shape, scale=0.05):
        return jax.random.normal(k, shape, jnp.float32) * scale

    out_ch = patch_size * patch_size * 3
    return {
        # BertLMPredictionHead.transform.dense
        "mlm_dense_w": w(ks[0], (hidden_size, hidden_size)),
        "mlm_dense_b": w(ks[1], (hidden_size,), 0.02),
        # BertLMPredictionHead.transform.LayerNorm
        "mlm_ln_g": jnp.ones((hidden_size,), jnp.float32) + w(ks[2], (hidden_size,), 0.01),
        "mlm_ln_b": w(ks[3], (hidden_size,), 0.01),
        # BertLMPredictionHead.decoder (+ tied bias)
        "mlm_decoder_w": w(ks[4], (hidden_size, vocab_size)),
        "mlm_decoder_b": w(ks[5], (vocab_size,), 0.02),
        # img_decoder Conv2d(hidden, patch**2*3, k=1): PyTorch (out,in,1,1) stored
        # flattened as (in, out) for the matmul form.
        "conv_w": w(ks[6], (hidden_size, out_ch)),
        "conv_b": w(ks[7], (out_ch,), 0.02),
    }


# ------------------------------------ main ------------------------------------ #

if __name__ == "__main__":
    # small config: hidden=32, seq=8, batch=2, vocab=128 (lane-dense), patch_size=4,
    # image decoder input on a 4x4 token grid -> 16x16 reconstructed image.
    B, S, hidden_size = 2, 8, 32
    vocab_size = 128
    patch_size = 4
    Hp = Wp = 4

    root = jax.random.PRNGKey(0)
    k_txt, k_img, k_par = jax.random.split(root, 3)

    text_seq_output = jax.random.normal(k_txt, (B, S, hidden_size), jnp.float32)
    image_seq_output = jax.random.normal(k_img, (B, hidden_size, Hp, Wp), jnp.float32)
    params = init_params(k_par, hidden_size, vocab_size, patch_size)

    mlm_logits, mpm_logits = mbsd_pretrain_head_forward(
        text_seq_output, image_seq_output, params, patch_size)
    mlm_logits = jax.block_until_ready(mlm_logits)
    mpm_logits = jax.block_until_ready(mpm_logits)

    assert mlm_logits.shape == (B, S, vocab_size), mlm_logits.shape
    assert mpm_logits.shape == (B, 3, Hp * patch_size, Wp * patch_size), mpm_logits.shape
    assert bool(jnp.all(jnp.isfinite(mlm_logits)))
    assert bool(jnp.all(jnp.isfinite(mpm_logits)))
    print("KERNEL_OK")
</pallas_src>

<mosaic_0001>
module attributes {stable_mosaic.version = 11 : i64} {
  func.func @_mlm_head_kernel(%arg0: i32, %arg1: memref<8x32xf32, #tpu.memory_space<vmem>>, %arg2: memref<32x32xf32, #tpu.memory_space<vmem>>, %arg3: memref<1x32xf32, #tpu.memory_space<vmem>>, %arg4: memref<1x32xf32, #tpu.memory_space<vmem>>, %arg5: memref<1x32xf32, #tpu.memory_space<vmem>>, %arg6: memref<32x128xf32, #tpu.memory_space<vmem>>, %arg7: memref<1x128xf32, #tpu.memory_space<vmem>>, %arg8: memref<8x128xf32, #tpu.memory_space<vmem>>) attributes {dimension_semantics = [#tpu.dimension_semantics<parallel>], iteration_bounds = array<i64: 2>, scalar_prefetch = 0 : i64, scratch_operands = 0 : i64, tpu.core_type = #tpu.core_type<tc>, window_params = [{transform_indices = @transform_0, window_bounds = array<i64: 8, 32>}, {pipeline_mode = #tpu.pipeline_mode<synchronous>, transform_indices = @transform_1, window_bounds = array<i64: 32, 32>}, {pipeline_mode = #tpu.pipeline_mode<synchronous>, transform_indices = @transform_2, window_bounds = array<i64: 1, 32>}, {pipeline_mode = #tpu.pipeline_mode<synchronous>, transform_indices = @transform_3, window_bounds = array<i64: 1, 32>}, {pipeline_mode = #tpu.pipeline_mode<synchronous>, transform_indices = @transform_4, window_bounds = array<i64: 1, 32>}, {pipeline_mode = #tpu.pipeline_mode<synchronous>, transform_indices = @transform_5, window_bounds = array<i64: 32, 128>}, {pipeline_mode = #tpu.pipeline_mode<synchronous>, transform_indices = @transform_6, window_bounds = array<i64: 1, 128>}, {transform_indices = @transform_7, window_bounds = array<i64: 8, 128>}]} {
    %c0 = arith.constant 0 : index
    %c0_0 = arith.constant 0 : index
    %0 = vector.load %arg1[%c0, %c0_0] : memref<8x32xf32, #tpu.memory_space<vmem>>, vector<8x32xf32>
    %c0_1 = arith.constant 0 : index
    %c0_2 = arith.constant 0 : index
    %1 = vector.load %arg2[%c0_1, %c0_2] : memref<32x32xf32, #tpu.memory_space<vmem>>, vector<32x32xf32>
    %cst = arith.constant dense<0.000000e+00> : vector<8x32xf32>
    %2 = tpu.matmul %0, %1, %cst {dimension_numbers = #tpu.dot_dimension_numbers<[1], [0], [0], [1], [0, 0, 1, 1], [], []>} : vector<8x32xf32>, vector<32x32xf32>, vector<8x32xf32> -> vector<8x32xf32>
    %c0_3 = arith.constant 0 : index
    %c0_4 = arith.constant 0 : index
    %3 = vector.load %arg3[%c0_3, %c0_4] : memref<1x32xf32, #tpu.memory_space<vmem>>, vector<1x32xf32>
    %4 = vector.broadcast %3 : vector<1x32xf32> to vector<8x32xf32>
    %5 = arith.addf %2, %4 : vector<8x32xf32>
    %6 = arith.mulf %5, %5 : vector<8x32xf32>
    %7 = arith.mulf %6, %5 : vector<8x32xf32>
    %cst_5 = arith.constant 5.000000e-01 : f32
    %8 = vector.broadcast %cst_5 : f32 to vector<8x32xf32>
    %9 = arith.mulf %8, %5 : vector<8x32xf32>
    %cst_6 = arith.constant 4.471500e-02 : f32
    %10 = vector.broadcast %cst_6 : f32 to vector<8x32xf32>
    %11 = arith.mulf %10, %7 : vector<8x32xf32>
    %12 = arith.addf %5, %11 : vector<8x32xf32>
    %cst_7 = arith.constant 0.797884583 : f32
    %13 = vector.broadcast %cst_7 : f32 to vector<8x32xf32>
    %14 = arith.mulf %13, %12 : vector<8x32xf32>
    %15 = math.tanh %14 : vector<8x32xf32>
    %cst_8 = arith.constant 1.000000e+00 : f32
    %16 = vector.broadcast %cst_8 : f32 to vector<8x32xf32>
    %17 = arith.addf %16, %15 : vector<8x32xf32>
    %18 = arith.mulf %9, %17 : vector<8x32xf32>
    %cst_9 = arith.constant dense<0.000000e+00> : vector<8xf32>
    %19 = vector.multi_reduction <add>, %18, %cst_9 [1] : vector<8x32xf32> to vector<8xf32>
    %20 = vector.shape_cast %19 : vector<8xf32> to vector<8x1xf32>
    %cst_10 = arith.constant 3.200000e+01 : f32
    %21 = vector.broadcast %cst_10 : f32 to vector<8x1xf32>
    %22 = arith.divf %20, %21 : vector<8x1xf32>
    %23 = arith.mulf %18, %18 : vector<8x32xf32>
    %cst_11 = arith.constant dense<0.000000e+00> : vector<8xf32>
    %24 = vector.multi_reduction <add>, %23, %cst_11 [1] : vector<8x32xf32> to vector<8xf32>
    %25 = vector.shape_cast %24 : vector<8xf32> to vector<8x1xf32>
    %cst_12 = arith.constant 3.200000e+01 : f32
    %26 = vector.broadcast %cst_12 : f32 to vector<8x1xf32>
    %27 = arith.divf %25, %26 : vector<8x1xf32>
    %28 = arith.mulf %22, %22 : vector<8x1xf32>
    %29 = arith.subf %27, %28 : vector<8x1xf32>
    %cst_13 = arith.constant 0.000000e+00 : f32
    %30 = vector.broadcast %cst_13 : f32 to vector<8x1xf32>
    %31 = arith.maximumf %29, %30 : vector<8x1xf32>
    %32 = vector.broadcast %22 : vector<8x1xf32> to vector<8x32xf32>
    %33 = arith.subf %18, %32 : vector<8x32xf32>
    %cst_14 = arith.constant 9.99999996E-13 : f32
    %34 = vector.broadcast %cst_14 : f32 to vector<8x1xf32>
    %35 = arith.addf %31, %34 : vector<8x1xf32>
    %36 = math.rsqrt %35 : vector<8x1xf32>
    %37 = vector.broadcast %36 : vector<8x1xf32> to vector<8x32xf32>
    %38 = arith.mulf %33, %37 : vector<8x32xf32>
    %c0_15 = arith.constant 0 : index
    %c0_16 = arith.constant 0 : index
    %39 = vector.load %arg4[%c0_15, %c0_16] : memref<1x32xf32, #tpu.memory_space<vmem>>, vector<1x32xf32>
    %40 = vector.broadcast %39 : vector<1x32xf32> to vector<8x32xf32>
    %41 = arith.mulf %40, %38 : vector<8x32xf32>
    %c0_17 = arith.constant 0 : index
    %c0_18 = arith.constant 0 : index
    %42 = vector.load %arg5[%c0_17, %c0_18] : memref<1x32xf32, #tpu.memory_space<vmem>>, vector<1x32xf32>
    %43 = vector.broadcast %42 : vector<1x32xf32> to vector<8x32xf32>
    %44 = arith.addf %41, %43 : vector<8x32xf32>
    %c0_19 = arith.constant 0 : index
    %c0_20 = arith.constant 0 : index
    %45 = vector.load %arg6[%c0_19, %c0_20] : memref<32x128xf32, #tpu.memory_space<vmem>>, vector<32x128xf32>
    %cst_21 = arith.constant dense<0.000000e+00> : vector<8x128xf32>
    %46 = tpu.matmul %44, %45, %cst_21 {dimension_numbers = #tpu.dot_dimension_numbers<[1], [0], [0], [1], [0, 0, 1, 1], [], []>} : vector<8x32xf32>, vector<32x128xf32>, vector<8x128xf32> -> vector<8x128xf32>
    %c0_22 = arith.constant 0 : index
    %c0_23 = arith.constant 0 : index
    %47 = vector.load %arg7[%c0_22, %c0_23] : memref<1x128xf32, #tpu.memory_space<vmem>>, vector<1x128xf32>
    %48 = vector.broadcast %47 : vector<1x128xf32> to vector<8x128xf32>
    %49 = arith.addf %46, %48 : vector<8x128xf32>
    %c0_24 = arith.constant 0 : index
    %c0_25 = arith.constant 0 : index
    %50 = vector.load %arg8[%c0_24, %c0_25] : memref<8x128xf32, #tpu.memory_space<vmem>>, vector<8x128xf32>
    tpu.vector_store %arg8[%c0_24, %c0_25], %49 {strides = array<i32>} : memref<8x128xf32, #tpu.memory_space<vmem>>, vector<8x128xf32>,
    return
  }
  func.func @transform_0(%arg0: i32) -> (i32, i32) {
    %c0_i32 = arith.constant 0 : i32
    %c0_i32_0 = arith.constant 0 : i32
    return %arg0, %c0_i32 : i32, i32
  }
  func.func @transform_1(%arg0: i32) -> (i32, i32) {
    %c0_i32 = arith.constant 0 : i32
    %c0_i32_0 = arith.constant 0 : i32
    %c0_i32_1 = arith.constant 0 : i32
    return %c0_i32, %c0_i32_0 : i32, i32
  }
  func.func @transform_2(%arg0: i32) -> (i32, i32) {
    %c0_i32 = arith.constant 0 : i32
    %c0_i32_0 = arith.constant 0 : i32
    %c0_i32_1 = arith.constant 0 : i32
    return %c0_i32, %c0_i32_0 : i32, i32
  }
  func.func @transform_3(%arg0: i32) -> (i32, i32) {
    %c0_i32 = arith.constant 0 : i32
    %c0_i32_0 = arith.constant 0 : i32
    %c0_i32_1 = arith.constant 0 : i32
    return %c0_i32, %c0_i32_0 : i32, i32
  }
  func.func @transform_4(%arg0: i32) -> (i32, i32) {
    %c0_i32 = arith.constant 0 : i32
    %c0_i32_0 = arith.constant 0 : i32
    %c0_i32_1 = arith.constant 0 : i32
    return %c0_i32, %c0_i32_0 : i32, i32
  }
  func.func @transform_5(%arg0: i32) -> (i32, i32) {
    %c0_i32 = arith.constant 0 : i32
    %c0_i32_0 = arith.constant 0 : i32
    %c0_i32_1 = arith.constant 0 : i32
    return %c0_i32, %c0_i32_0 : i32, i32
  }
  func.func @transform_6(%arg0: i32) -> (i32, i32) {
    %c0_i32 = arith.constant 0 : i32
    %c0_i32_0 = arith.constant 0 : i32
    %c0_i32_1 = arith.constant 0 : i32
    return %c0_i32, %c0_i32_0 : i32, i32
  }
  func.func @transform_7(%arg0: i32) -> (i32, i32) {
    %c0_i32 = arith.constant 0 : i32
    %c0_i32_0 = arith.constant 0 : i32
    return %arg0, %c0_i32 : i32, i32
  }
}

</mosaic_0001>

<bundles_post_ra>
// kernel: tpu_custom_call.1
= control target key start
LH: loop header
LB: loop body
LE: loop exit
PB: predicated region body
PF: predicated region fallthrough
CT: control target
= control target key end

     0   :  { %s1157_s0 = inlined_call_operand.hbm [shape: f32[16,32], index: 0, kind: input, shape index: {}]   ;;  %s1158_s1 = inlined_call_operand.hbm [shape: f32[32,32], index: 1, kind: input, shape index: {}]   ;;  %s1159_s2 = inlined_call_operand.vmem [shape: f32[1,32], index: 2, kind: input, shape index: {}]   ;;  %s1160_s3 = inlined_call_operand.vmem [shape: f32[1,32], index: 3, kind: input, shape index: {}]   ;;  %s1161_s4 = inlined_call_operand.vmem [shape: f32[1,32], index: 4, kind: input, shape index: {}]   ;;  %s1162_s5 = inlined_call_operand.hbm [shape: f32[32,128], index: 5, kind: input, shape index: {}]   ;;  %s1163_s6 = inlined_call_operand.vmem [shape: f32[1,128], index: 6, kind: input, shape index: {}]   ;;  %s1164_s7 = inlined_call_operand.hbm [shape: f32[16,128], index: 7, kind: output, shape index: {}]  }
   0x1   :  { %1169 = sst [smem:[#allocation12_spill]] %s1158_s1 }
   0x2   :  { %1170 = sst [smem:[#allocation13_spill]] %s1162_s5 }
   0x3   :  { %12 = vsyncpa [#allocation3], 0 }
   0x4   :  { %14 = vsyncpa [#allocation3 + $0x1], 0 }
   0x5   :  { %15 = vsyncpa [#allocation6], 0 }
   0x6   :  { %16 = vsyncpa [#allocation4], 0 }
   0x7   :  { %18 = vsyncpa [#allocation4 + $0x1], 0  ;;  %s966_s24 = smov 0   ;;  %s968_s25 = smov 0  }
   0x8   :  { %s970_s26 = smov 0   ;;  %s972_s27 = smov 0  }
   0x9 LB: > { %s987_s28 = sadd.s32 4294967295, %s916_s27   ;;  %s639_s29 = sadd.s32 4294967294, %s916_s27   ;;  %s916_s27 = sphi %s972_s27, %s1190_s27   ;;  %s912_s26 = sphi %s970_s26, %s1189_s26   ;;  %s908_s25 = sphi %s968_s25, %s1188_s25   ;;  %s904_s24 = sphi %s966_s24, %s1187_s24  }
   0xa   : > { %p44_p0 = scmp.ne.s32.totalorder %s908_s25, %s904_s24  ;;  %p1165_p1 = scmp.eq.s32.totalorder %s987_s28, 0 }
   0xb   : > { %p200_p3 = scmp.eq.s32.totalorder %s639_s29, 1  ;;  %p640_p5 = scmp.ge.s32.totalorder %s916_s27, 1 }
   0xc   : > { %p996_p4 = por %p1165_p1, %p44_p0  ;;  %p207_p7 = scmp.lt.s32.totalorder %s916_s27, 3 }
   0xd   : > { %p1001_p6 = por %p200_p3, %p44_p0  ;;  %s918_s10 = smov [#allocation5]  }
   0xe   : > { %s1171_s30 = scalar_select %p996_p4, 1, 0 }
   0xf   : > { %s1172_s8 = scalar_select %p1001_p6, 1, 0 }
  0x10   : > { %p1006_p8 = pnand %p640_p5, %p207_p7  ;;  %s219_s11 = sshll.u32 %s918_s10, 4  ;;  %s220_s11 = int_to_ptr.vmem [resolvable:$true] %s219_s11 }
  0x11   : > { %s919_s13 = smov [#allocation7]   ;;  %s779_s15 = scalar_lea.vmem %s220_s11, 512 }
  0x12   : > { %s1173_s9 = scalar_select %p1006_p8, 1, 0 }
  0x13   : > { %p705_p9 = pneg %p1006_p8  ;;  %s241_s14 = sshll.u32 %s919_s13, 4  ;;  %s242_s14 = int_to_ptr.vmem [resolvable:$true] %s241_s14 }
  0x14   : > { %p780_p13 = scmp.ne.s32.totalorder %s220_s11, %s779_s15  ;;  %p787_p5 = scmp.lt.s32.totalorder %s220_s11, %s220_s11 }
  0x15   : > { %p1015_p11 = pnand %p705_p9, %p1165_p1  ;;  %p788_p7 = scmp.lt.s32.totalorder %s779_s15, %s779_s15 }
  0x17   : > { %p770_p12 = pneg %p1015_p11  ;;  %p789_p10 = por %p788_p7, %p787_p5 }
  0x19   : > { %p782_p0 = pnand %p780_p13, %p770_p12 }
  0x1b   : > { %p783_p3 = pneg %p782_p0 }
  0x1d   : > { %p790_p9 = pnand %p789_p10, %p783_p3 }
  0x1f   : > { %793 = shalt.err (!%p790_p9)
}
  0x20   : > { %s920_s16 = smov 128   ;;  %s921_s17 = smov 8  }
  0x21   : > { %s1175_s1 = sld [smem:[#allocation12_spill]]  ;;  %s805_s20 = scalar_lea.vmem %s242_s14, 512 }
  0x22   : > { %p806_p1 = scmp.ne.s32.totalorder %s242_s14, %s805_s20  ;;  %p813_p2 = scmp.lt.s32.totalorder %s242_s14, %s242_s14 }
  0x23   : > { %p814_p6 = scmp.lt.s32.totalorder %s805_s20, %s805_s20 }
  0x24   : > { %p808_p13 = pnand %p806_p1, %p770_p12 }
  0x25   : > { %p815_p5 = por %p814_p6, %p813_p2 }
  0x26   : > { %p809_p0 = pneg %p808_p13 }
  0x27   : > { %708 = dma.hbm_to_vmem [thread:$0]  (!%p1015_p11), %s1175_s1, 512, %s220_s11, [#allocation6], %s920_s16, %s920_s16, %s921_s17  }
  0x28   : > { %p816_p10 = pnand %p815_p5, %p809_p0 }
  0x2a   : > { %819 = shalt.err (!%p816_p10)
}
  0x2b   : > { %s1176_s5 = sld [smem:[#allocation13_spill]]  ;;  %s1038_s23 = sadd.s32 1, %s916_s27  }
  0x2c   : > { %s31_s29 = sadd.s32 1, %s912_s26  ;;  %s28_s10 = ssub.s32 %s916_s27, %s1038_s23 }
  0x2d   : > { %p38_p1 = scmp.ne.s32.totalorder %s912_s26, %s908_s25  ;;  %p29_p2 = scmp.eq.s32.totalorder %s28_s10, 0 }
  0x2e   : > { %p39_p6 = scmp.eq.s32.totalorder %s916_s27, 0  ;;  %p1177_p12 = scmp.eq.s32.totalorder %s987_s28, 1 }
  0x2f   : > { %p722_p7 = scmp.lt.s32.totalorder %s916_s27, 2  ;;  %s258_s13 = sand.u32 1, %s912_s26  }
  0x30   : > { %p1048_p3 = por %p1177_p12, %p38_p1  ;;  %p40_p9 = por %p39_p6, %p38_p1 }
  0x31   : > { %711 = dma.hbm_to_vmem [thread:$0]  (!%p1015_p11), %s1176_s5, 512, %s242_s14, [#allocation6], %s920_s16, %s920_s16, %s921_s17  }
  0x32   : > { %s1178_s11 = scalar_select %p1048_p3, 1, 0 }
  0x33   : > { %s1054_s12 = scalar_select %p29_p2, %s912_s26, %s31_s29  }
  0x34   : > { %s644_s15 = sshll.u32 %s258_s13, 3  ;;  %s645_s14 = sshll.u32 %s916_s27, 7 }
  0x35   : > { %s1061_s18 = scalar_lea.hbm %s1157_s0, %s645_s14  ;;  %s262_s19 = scalar_lea.vmem [#allocation2], %s644_s15 }
  0x36   : > { %s269_s20 = sshll.u32 %s262_s19, 4  ;;  %p1063_p11 = pnand %p722_p7, %p40_p9  ;;  %s270_s20 = int_to_ptr.vmem [resolvable:$true] %s269_s20 }
  0x37   : > { %s259_s22 = scalar_lea.sflag [#allocation3], %s258_s13  ;;  %s820_s29 = scalar_lea.hbm %s1061_s18, 128 }
  0x38   : > { %p821_p13 = scmp.ne.s32.totalorder %s1061_s18, %s820_s29  ;;  %p822_p0 = pneg %p1063_p11 }
  0x39   : > { %s825_s16 = scalar_lea.hbm %s1157_s0, 256  ;;  %p826_p1 = scmp.lt.s32.totalorder %s1061_s18, %s1157_s0 }
  0x3a   : > { %p823_p5 = pnand %p822_p0, %p821_p13  ;;  %p827_p2 = scmp.lt.s32.totalorder %s825_s16, %s820_s29 }
  0x3c   : > { %p824_p10 = pneg %p823_p5  ;;  %p828_p6 = por %p827_p2, %p826_p1 }
  0x3e   : > { %p829_p12 = pnand %p828_p6, %p824_p10 }
  0x40   : > { %832 = shalt.err (!%p829_p12)
}
  0x41   : > { %s833_s19 = scalar_lea.vmem %s270_s20, 128  ;;  %s922_s13 = smov [#allocation2]  }
  0x42   : > { %p834_p7 = scmp.ne.s32.totalorder %s270_s20, %s833_s19  ;;  %s838_s1 = sshll.u32 %s922_s13, 4  ;;  %s839_s1 = int_to_ptr.vmem [resolvable:$false] %s838_s1 }
  0x43   : > { %s840_s5 = scalar_lea.vmem %s839_s1, 256  ;;  %p841_p13 = scmp.lt.s32.totalorder %s270_s20, %s839_s1 }
  0x44   : > { %p836_p9 = pnand %p834_p7, %p822_p0  ;;  %p842_p5 = scmp.lt.s32.totalorder %s840_s5, %s833_s19 }
  0x46   : > { %p837_p3 = pneg %p836_p9  ;;  %p843_p4 = por %p842_p5, %p841_p13 }
  0x48   : > { %p844_p8 = pnand %p843_p4, %p837_p3 }
  0x4a   : > { %847 = shalt.err (!%p844_p8)
}
  0x4b   : > { %715 = dma.hbm_to_vmem [thread:$0]  (!%p1063_p11), %s1061_s18, 128, %s270_s20, %s259_s22  }
  0x4c   : > { %p1180_p10 = scmp.ne.s32.totalorder %s1173_s9, 0 }
  0x4d   : > { %s1084_s29 = sand.u32 (!%p1180_p10), 1, %s908_s25   ;;  %p1181_p4 = scmp.ne.s32.totalorder (!%p1180_p10), %s1171_s30, 0 }
  0x4e   : > { %278 = sbr.rel (%p1180_p10) target bundleno = 699 (0x2bb), region = 48  ;;  %s647_s10 = sshll.u32 (!%p1180_p10), %s1084_s29, 3 }
  0x4f   : > { %s281_s1 = scalar_lea.sflag (!%p1180_p10), [#allocation3], %s1084_s29  ;;  %s284_s5 = scalar_lea.vmem (!%p1180_p10), [#allocation2], %s647_s10 }
  0x53   : > { %891 = dma.done.wait (%p1181_p4), %s281_s1, 128  }
  0x54   : > { %893 = vsyncadd (%p1181_p4), %s281_s1, 4294967168  ;;  %p1182_p8 = scmp.eq.s32.totalorder %s987_s28, 0 }
  0x56   : > { %895 = dma.done.wait (%p1182_p8), [#allocation6], 1024   ;;  %p1183_p3 = pmov %p1182_p8 }
  0x57   : > { %v923_v0 = vmov 0.0   ;;  %vm924_vm0 = vmmov 0   ;;  %v327_v1 = vld [vmem:[#allocation5 + $0x18] sm:$0xff]  ;;  %v326_v2 = vld [vmem:[#allocation5 + $0x10] sm:$0xff]  ;;  %v325_v3 = vld [vmem:[#allocation5 + $0x8] sm:$0xff]  ;;  %vm335_vm1 = vcmask 261120  }
  0x58   : > { %897 = vsyncadd (%p1183_p3), [#allocation6], 4294966272  ;;  %671 = vmatprep.subr.mxu0 %v923_v0  ;;  %679 = vmatprep.mubr.msk.f32.mxu0 %vm924_vm0, %v923_v0  ;;  %v324_v4 = vld [vmem:[#allocation5] sm:$0xff]  ;;  %v323_v5 = vld [vmem:[%s284_s5] sm:$0xff]  ;;  %s658_s17 = sshll.u32 %s987_s28, 7  ;;  %s322_s15 = scalar_lea.vmem [#allocation8], %s647_s10 }
  0x59   : > { %682 = vmatprep.subr.mxu1 %v923_v0  ;;  %690 = vmatprep.mubr.msk.f32.mxu1 %vm924_vm0, %v923_v0  ;;  %v651_v6 = vld [vmem:[%s1159_s2] ss:$0 sm:$0xff]  ;;  %v454_v22 = vld [vmem:[#allocation7 + $0x18] sm:$0xff]  ;;  %v452_v24 = vld [vmem:[#allocation7 + $0x8] sm:$0xff]  ;;  %s550_s19 = sshll.u32 %s322_s15, 4  ;;  %s1120_s5 = scalar_lea.hbm %s1164_s7, %s658_s17  ;;  %s551_s19 = int_to_ptr.vmem [resolvable:$true] %s550_s19 }
  0x5a   : > { %672 = vmatpush3.msra.mxu0 %v327_v1  ;;  %v453_v23 = vld [vmem:[#allocation7 + $0x10] sm:$0xff]  ;;  %683 = vmatpush3.msra.mxu1 %v454_v22  ;;  %v451_v25 = vld [vmem:[#allocation7] sm:$0xff]  ;;  %s537_s30 = scalar_lea.sflag [#allocation4], %s1084_s29  ;;  %s848_s9 = scalar_lea.vmem %s551_s19, 128 }
  0x5b   : > { %673 = vmatprep.subr.mxu0 %v923_v0  ;;  %684 = vmatprep.subr.mxu1 %v923_v0  ;;  %v653_v36 = vld [vmem:[%s1160_s3] ss:$0 sm:$0xff]  ;;  %p849_p11 = scmp.ne.s32.totalorder %s551_s19, %s848_s9  ;;  %p1184_p0 = scmp.ne.s32.totalorder %s1178_s11, 0 }
  0x5c   : > { %674 = vmatpush3.msra.mxu0 %v326_v2  ;;  %685 = vmatpush3.msra.mxu1 %v453_v23  ;;  %v654_v38 = vld [vmem:[%s1161_s4] ss:$0 sm:$0xff]  ;;  %s925_s28 = smov [#allocation8]  }
  0x5d   : > { %675 = vmatprep.subr.mxu0 %v923_v0  ;;  %686 = vmatprep.subr.mxu1 %v923_v0  ;;  %v655_v41 = vld [vmem:[%s1163_s6] ss:$0 sm:$0xff]  ;;  %p850_p1 = pnand %p849_p11, %p1184_p0  ;;  %s852_s18 = sshll.u32 %s925_s28, 4  ;;  %s853_s18 = int_to_ptr.vmem [resolvable:$false] %s852_s18 }
  0x5e   : > { %676 = vmatpush3.msra.mxu0 %v325_v3  ;;  %687 = vmatpush3.msra.mxu1 %v452_v24  ;;  %s854_s10 = scalar_lea.vmem %s853_s18, 256  ;;  %p855_p6 = scmp.lt.s32.totalorder %s551_s19, %s853_s18 }
  0x5f   : > { %677 = vmatprep.subr.mxu0 %v923_v0  ;;  %688 = vmatprep.subr.mxu1 %v923_v0  ;;  %p851_p2 = pneg %p850_p1  ;;  %p856_p12 = scmp.lt.s32.totalorder %s854_s10, %s848_s9 }
  0x60   : > { %678 = vmatpush3.msra.mxu0 %v324_v4  ;;  %689 = vmatpush3.msra.mxu1 %v451_v25 }
  0x61   : > { %680 = vmatmul.mubr.msk.f32.vlgmr.msra.gmra.mxu0 %vm335_vm1, %v323_v5  ;;  %p857_p7 = por %p856_p12, %p855_p6 }
  0x63   : > { %p858_p9 = pnand %p857_p7, %p851_p2 }
 0x121   : > { %v405_v7 = vpop.f32.mrf.mxu0 }
 0x122   : > { %v406_v8 = vadd.f32 %v651_v6, %v405_v7 }
 0x123   : > { %v681_v9 = vpop.f32.mrf.mxu0 }
 0x124   : > { %v409_v10 = vmul.f32 %v406_v8, %v406_v8  ;;  %v411_v16 = vmul.f32 0.5, %v406_v8 }
 0x126   : > { %v410_v11 = vmul.f32 %v409_v10, %v406_v8 }
 0x128   : > { %v412_v12 = vmul.f32 0.044715, %v410_v11 }
 0x12a   : > { %v413_v13 = vadd.f32 %v412_v12, %v406_v8 }
 0x12c   : > { %v414_v14 = vmul.f32 0.7978846, %v413_v13 }
 0x12e   : > { %764 = vtanh.f32 %v414_v14 }
 0x13b   : > { %v765_v15 = vpop.eup %764 }
 0x13c   : > { %v416_v17 = vadd.f32 1.0, %v765_v15 }
 0x13e   : > { %v417_v18 = vmul.f32 %v416_v17, %v411_v16 }
 0x140   : > { %v418_v19 = vsel %vm335_vm1, %v417_v18, 0.0  ;;  %v423_v20 = vmul.f32 %v417_v18, %v417_v18 }
 0x141   : > { %419 = vadd.xlane.f32.xlu0 %v418_v19 }
 0x142   : > { %v424_v21 = vsel %vm335_vm1, %v423_v20, 0.0 }
 0x145   : > { %425 = vadd.xlane.f32.xlu0 %v424_v21 }
 0x1ca   : > { %v420_v26 = vpop.xlane.xlu0 %419 }
 0x1cb   : > { %v422_v27 = vmul.f32 0.03125, %v420_v26 }
 0x1cd   : > { %v428_v29 = vmul.f32 %v422_v27, %v422_v27  ;;  %v431_v34 = vsub.f32 %v417_v18, %v422_v27 }
 0x1ce   : > { %v426_v28 = vpop.xlane.xlu0 %425 }
 0x1cf   : > { %v427_v30 = vmul.f32 0.03125, %v426_v28 }
 0x1d1   : > { %v429_v31 = vsub.f32 %v427_v30, %v428_v29 }
 0x1d3   : > { %v430_v32 = vmax.f32 %v429_v31, 0.0 }
 0x1d5   : > { %v432_v33 = vadd.f32 1e-12, %v430_v32 }
 0x1d7   : > { %766 = vrsqrt.f32 %v432_v33 }
 0x1e4   : > { %v767_v35 = vpop.eup %766 }
 0x1e5   : > { %v434_v37 = vmul.f32 %v767_v35, %v431_v34 }
 0x1e7   : > { %v442_v39 = vmul.f32 %v653_v36, %v434_v37 }
 0x1e9   : > { %v450_v40 = vadd.f32 %v654_v38, %v442_v39 }
 0x1eb   : > { %691 = vmatmul.mubr.msk.f32.vlgmr.msra.gmra.mxu1 %vm335_vm1, %v450_v40 }
 0x2ab   : > { %v531_v42 = vpop.f32.mrf.mxu1 }
 0x2ac   : > { %v532_v43 = vadd.f32 %v655_v41, %v531_v42 }
 0x2ad   : > { %v692_v44 = vpop.f32.mrf.mxu1 }
 0x2ae   : > { %535 = vst [vmem:[%s322_s15] sm:$0xff] %v532_v43 }
 0x2af   : > { %861 = shalt.err (!%p858_p9)
}
 0x2b0   : > { %s862_s20 = scalar_lea.hbm %s1120_s5, 128  ;;  %s866_s22 = scalar_lea.hbm %s1164_s7, 256 }
 0x2b1   : > { %p863_p13 = scmp.ne.s32.totalorder %s1120_s5, %s862_s20  ;;  %p867_p4 = scmp.lt.s32.totalorder %s1120_s5, %s1164_s7 }
 0x2b2   : > { %p868_p8 = scmp.lt.s32.totalorder %s866_s22, %s862_s20 }
 0x2b3   : > { %p864_p5 = pnand %p863_p13, %p1184_p0 }
 0x2b4   : > { %p869_p3 = por %p868_p8, %p867_p4 }
 0x2b5   : > { %p865_p10 = pneg %p864_p5 }
 0x2b7   : > { %p870_p11 = pnand %p869_p3, %p865_p10 }
 0x2b9   : > { %873 = shalt.err (!%p870_p11)
}
 0x2ba   : > { %703 = dma.vmem_to_hbm [thread:$0]  (%p1184_p0), %s551_s19, 128, %s1120_s5, %s537_s30  }
 0x2bb PF: > { %s562_s17 = sand.u32 1, %s904_s24   ;;  %p1185_p1 = scmp.ne.s32.totalorder %s1172_s8, 0 }
 0x2bc   : > { %p1186_p2 = scmp.ge.s32.totalorder %s916_s27, 2  ;;  %s563_s15 = scalar_lea.sflag [#allocation4], %s562_s17 }
 0x2be   : > { %p717_p6 = pnand %p1186_p2, %p1185_p1 }
 0x2c0   : > { %p718_p12 = pneg %p717_p6 }
 0x2c2   : > { %899 = dma.done.wait (%p718_p12), %s563_s15, 128  }
 0x2c3   : > { %901 = vsyncadd (%p718_p12), %s563_s15, 4294967168  ;;  %p21_p7 = scmp.ge.s32.totalorder %s1038_s23, 4   ;;  %s1187_s24 = smov %s908_s25 }
 0x2c4   : > { %s1188_s25 = smov %s912_s26  ;;  %s1189_s26 = smov %s1054_s12 }
 0x2c5   : > { %s1190_s27 = smov %s1038_s23  ;;  %23 = sbr.rel (!%p21_p7) target bundleno = 9 (0x9), region = 101 }
 0x2ca   :  { %568 = vsyncpa [#allocation3], 1 }
 0x2cb   :  { %570 = vsyncpa [#allocation3 + $0x1], 1 }
 0x2cc   :  { %571 = vsyncpa [#allocation6], 1 }
 0x2cd   :  { %572 = vsyncpa [#allocation4], 1 }
 0x2ce   :  { %574 = vsyncpa [#allocation4 + $0x1], 1 }

</bundles_post_ra>
